<compile_context>
chip_gen: v5e
topology: v5e:2x2
jax: 0.10.0
libtpu: 0.0.40
codegen_flags: <defaults>
</compile_context>

<pallas_src>
import functools

import jax
import jax.numpy as jnp
from jax.experimental import pallas as pl
from jax.experimental.pallas import tpu as pltpu


def _round_up(x, m):
    return ((x + m - 1) // m) * m


def _choose_tiles(n, tm_default=256, tk_default=1024):
    """Row tile tm, contraction tile tk (multiple of tm), padded node count."""
    n8 = _round_up(max(n, 8), 8)
    tm = _round_up(min(tm_default, n8), 8)
    tk = min(tk_default, _round_up(n8, tm))
    tk = max(tm, (tk // tm) * tm)          # tk is a multiple of tm
    npad = _round_up(n8, tk)               # tm | tk | npad
    return tm, tk, npad


# ----------------------------------------------------------------------------
# Pallas kernel: one AttentionLEConv layer, K-tiled mean aggregation.
# Grid = (row tiles [parallel], k tiles [arbitrary]).
# ----------------------------------------------------------------------------
def _attention_le_conv_kernel(kidx_ref, cnt_ref, adj_ref, xk_ref, xs_ref,
                              invdeg_ref, wr_ref, wn_ref, b_ref, att_ref,
                              o_ref, acc_ref, *, cout_p, apply_relu):
    del kidx_ref                                # only used by the index_maps
    i = pl.program_id(0)
    k = pl.program_id(1)

    @pl.when(k == 0)
    def _init():
        acc_ref[...] = jnp.zeros_like(acc_ref)

    # Sum-aggregation over one (tm, tk) adjacency tile.  All-zero tiles are
    # never reached (compacted k-index list); padded tail steps repeat the
    # last block index (DMA deduped) and are skipped here.
    @pl.when(k < cnt_ref[i])
    def _accumulate():
        a = adj_ref[...].astype(jnp.bfloat16)   # int8 counts -> bf16 (VPU slack)
        acc_ref[...] += jnp.dot(a, xk_ref[...],
                                preferred_element_type=jnp.float32)

    @pl.when(k == pl.num_programs(1) - 1)
    def _finalize():
        # mean aggregation = accumulated sum * 1/deg (exact f32 scale)
        agg = acc_ref[...] * invdeg_ref[...]                    # (tm, cin) f32
        x_self = xs_ref[...]                                    # (tm, cin) bf16
        # both branches (topology | sequence) packed along 2*cout_p lanes
        h = jnp.dot(x_self, wr_ref[...], preferred_element_type=jnp.float32)
        h = h + jnp.dot(agg.astype(jnp.bfloat16), wn_ref[...],
                        preferred_element_type=jnp.float32)
        h = h + b_ref[...]                                      # (tm, 2*cout_p)

        ht = h[:, :cout_p]
        hs = h[:, cout_p:]
        # per-node 2-way softmax gate: VPU multiply + lane reduce (no MXU)
        scores = h * att_ref[...]
        st = jnp.sum(scores[:, :cout_p], axis=-1, keepdims=True)
        ss = jnp.sum(scores[:, cout_p:], axis=-1, keepdims=True)
        m = jnp.maximum(st, ss)
        et = jnp.exp(st - m)
        es = jnp.exp(ss - m)
        inv = pl.reciprocal(et + es)            # exact; only (tm, 1) values
        out = (et * ht + es * hs) * inv
        if apply_relu:
            out = jnp.maximum(out, 0.0)
        o_ref[...] = out.astype(o_ref.dtype)


def _attention_le_conv_call(kidx, cnt, adj, x, inv_deg, w_root, w_neigh, b,
                            att, *, tm, tk, cout_p, apply_relu, out_dtype):
    npad, cin = x.shape
    nrt = npad // tm
    nkt = npad // tk
    kernel = functools.partial(_attention_le_conv_kernel, cout_p=cout_p,
                               apply_relu=apply_relu)
    out_bytes = jnp.dtype(out_dtype).itemsize
    cost = pl.CostEstimate(
        flops=int(2 * npad * npad * cin + 2 * 2 * npad * cin * (2 * cout_p)),
        transcendentals=int(2 * npad),
        bytes_accessed=int(npad * npad                     # int8 adjacency
                           + 2 * npad * cin * 2            # x (agg + self) bf16
                           + npad * cout_p * out_bytes     # output
                           + npad * 4                      # 1/deg
                           + 2 * cin * 2 * cout_p * 2),    # weights
    )
    grid_spec = pltpu.PrefetchScalarGridSpec(
        num_scalar_prefetch=2,
        grid=(nrt, nkt),
        in_specs=[
            # adjacency tile: row tile i, compacted nonzero k-tile index
            pl.BlockSpec((tm, tk), lambda i, k, kidx_r, cnt_r: (i, kidx_r[i, k])),
            # x rows for the aggregation term (k-tiled, same remapped index)
            pl.BlockSpec((tk, cin), lambda i, k, kidx_r, cnt_r: (kidx_r[i, k], 0)),
            # x rows for the self term (row-tiled)
            pl.BlockSpec((tm, cin), lambda i, k, kidx_r, cnt_r: (i, 0)),
            # 1/deg per destination row
            pl.BlockSpec((tm, 1), lambda i, k, kidx_r, cnt_r: (i, 0)),
            # weights / bias / attention vectors (constant across the grid)
            pl.BlockSpec(w_root.shape, lambda i, k, kidx_r, cnt_r: (0, 0)),
            pl.BlockSpec(w_neigh.shape, lambda i, k, kidx_r, cnt_r: (0, 0)),
            pl.BlockSpec(b.shape, lambda i, k, kidx_r, cnt_r: (0, 0)),
            pl.BlockSpec(att.shape, lambda i, k, kidx_r, cnt_r: (0, 0)),
        ],
        out_specs=pl.BlockSpec((tm, cout_p), lambda i, k, kidx_r, cnt_r: (i, 0)),
        scratch_shapes=[pltpu.VMEM((tm, cin), jnp.float32)],
    )
    return pl.pallas_call(
        kernel,
        out_shape=jax.ShapeDtypeStruct((npad, cout_p), out_dtype),
        grid_spec=grid_spec,
        compiler_params=pltpu.CompilerParams(
            dimension_semantics=("parallel", "arbitrary"),
            vmem_limit_bytes=48 * 1024 * 1024),  # leaves headroom on v7x's 64MiB
        cost_estimate=cost,
    )(kidx, cnt, adj, x, x, inv_deg, w_root, w_neigh, b, att)


# ----------------------------------------------------------------------------
# Adjacency / block-sparsity metadata (wrapper side).
# ----------------------------------------------------------------------------
def build_adjacency_and_degree(edge_index, npad):
    """int8 edge-multiplicity adjacency (padded) + f32 inverse in-degree."""
    src, dst = edge_index[0], edge_index[1]
    ones = jnp.ones(src.shape, jnp.int32)
    counts32 = jnp.zeros((npad, npad), jnp.int32).at[dst, src].add(ones)
    # TODO(synk): for very large graphs scatter straight into int8 (or build
    # (tm, tk) adjacency tiles on the fly) to drop the O(N^2) int32 pass.
    adj = counts32.astype(jnp.int8)      # edge multiplicity assumed <= 127
    deg = counts32.sum(axis=1, keepdims=True).astype(jnp.float32)
    inv_deg = jnp.where(deg > 0, 1.0 / jnp.maximum(deg, 1.0), 0.0)
    return adj, inv_deg


def _build_block_sparse_metadata(adj, tm, tk):
    """Per row-tile: compacted list of nonzero (tm, tk) k-tile indices + count."""
    npad = adj.shape[0]
    nrt, nkt = npad // tm, npad // tk
    nz = adj.reshape(nrt, tm, nkt, tk).sum(axis=(1, 3), dtype=jnp.int32) > 0
    cnt = nz.sum(axis=1, dtype=jnp.int32)                       # (nrt,)
    # stable sort -> nonzero tiles first, in ascending k-tile order
    order = jnp.argsort(jnp.where(nz, 0, 1).astype(jnp.int32),
                        axis=1, stable=True).astype(jnp.int32)
    kpos = jnp.arange(nkt, dtype=jnp.int32)[None, :]
    last = jnp.maximum(cnt - 1, 0)[:, None]
    last_idx = jnp.take_along_axis(order, last, axis=1)
    # tail (k >= cnt) repeats the last valid index so its DMA is deduped
    kidx = jnp.where(kpos < cnt[:, None], order, last_idx)
    return kidx, cnt


# ----------------------------------------------------------------------------
# Parameter init / packing and the wrapper.
# ----------------------------------------------------------------------------
def init_attention_le_encoder_params(key, in_channels, out_channels):
    """PyTorch-Linear-style uniform(-1/sqrt(fan_in), 1/sqrt(fan_in)) init."""
    def layer(k, cin, cout):
        ks = jax.random.split(k, 7)
        bw = 1.0 / (cin ** 0.5)
        ba = 1.0 / (cout ** 0.5)
        u = lambda kk, shp, bb: jax.random.uniform(kk, shp, jnp.float32, -bb, bb)
        return dict(
            wt_r=u(ks[0], (cin, cout), bw), wt_n=u(ks[1], (cin, cout), bw),
            bt=u(ks[2], (1, cout), bw),
            ws_r=u(ks[3], (cin, cout), bw), ws_n=u(ks[4], (cin, cout), bw),
            bs=u(ks[5], (1, cout), bw),
            att=u(ks[6], (2, cout), ba),
        )
    k1, k2 = jax.random.split(key)
    return (layer(k1, in_channels, 2 * out_channels),
            layer(k2, 2 * out_channels, out_channels))


def _pack_layer_params(p, cin_x, cout):
    """Pack both branches into lane-dense (…, 2*cout_p) arrays, bf16 weights."""
    cin = p["wt_r"].shape[0]
    cout_p = _round_up(cout, 128)
    w_root = jnp.zeros((cin_x, 2 * cout_p), jnp.float32)
    w_root = w_root.at[:cin, :cout].set(p["wt_r"])
    w_root = w_root.at[:cin, cout_p:cout_p + cout].set(p["ws_r"])
    w_neigh = jnp.zeros((cin_x, 2 * cout_p), jnp.float32)
    w_neigh = w_neigh.at[:cin, :cout].set(p["wt_n"])
    w_neigh = w_neigh.at[:cin, cout_p:cout_p + cout].set(p["ws_n"])
    b = jnp.zeros((1, 2 * cout_p), jnp.float32)
    b = b.at[:, :cout].set(p["bt"])
    b = b.at[:, cout_p:cout_p + cout].set(p["bs"])
    att = jnp.zeros((1, 2 * cout_p), jnp.float32)
    att = att.at[:, :cout].set(p["att"][0:1])
    att = att.at[:, cout_p:cout_p + cout].set(p["att"][1:2])
    return (w_root.astype(jnp.bfloat16), w_neigh.astype(jnp.bfloat16),
            b, att, cout_p)


def attention_le_encoder_forward(x, edge_index, params, *, tm=256, tk=1024):
    n, in_ch = x.shape
    out1 = params[0]["wt_r"].shape[1]        # 2 * out_channels
    out2 = params[1]["wt_r"].shape[1]        # out_channels

    tm, tk, npad = _choose_tiles(n, tm, tk)

    adj, inv_deg = build_adjacency_and_degree(edge_index, npad)
    kidx, cnt = _build_block_sparse_metadata(adj, tm, tk)

    x_p = jnp.zeros((npad, in_ch), jnp.bfloat16).at[:n, :].set(
        x.astype(jnp.bfloat16))

    wr1, wn1, b1, att1, c1p = _pack_layer_params(params[0], in_ch, out1)
    wr2, wn2, b2, att2, c2p = _pack_layer_params(params[1], c1p, out2)

    # conv1 (+ ReLU inside kernel); padded output columns are exactly zero.
    h1 = _attention_le_conv_call(kidx, cnt, adj, x_p, inv_deg, wr1, wn1, b1,
                                 att1, tm=tm, tk=tk, cout_p=c1p,
                                 apply_relu=True, out_dtype=jnp.bfloat16)
    # conv2 (no final ReLU). NOTE: padded ROWS of h1 are not zero (bias leaks
    # through) — harmless because adjacency's padded columns are zero and the
    # final slice drops those rows.
    h2 = _attention_le_conv_call(kidx, cnt, adj, h1, inv_deg, wr2, wn2, b2,
                                 att2, tm=tm, tk=tk, cout_p=c2p,
                                 apply_relu=False, out_dtype=jnp.float32)
    return h2[:n, :out2]


# ----------------------------------------------------------------------------
# Pure-JAX f32 reference.
# ----------------------------------------------------------------------------
def build_mean_adjacency(edge_index, num_nodes):
    src, dst = edge_index[0], edge_index[1]
    adj = jnp.zeros((num_nodes, num_nodes), jnp.float32)
    adj = adj.at[dst, src].add(1.0)
    deg = adj.sum(axis=1, keepdims=True)
    return jnp.where(deg > 0, adj / jnp.maximum(deg, 1.0), 0.0)


def _sage_mean(x, adj, w_r, w_n, b):
    return x @ w_r + (adj @ x) @ w_n + b


def _attention_le_conv_ref(x, adj, p):
    ht = _sage_mean(x, adj, p["wt_r"], p["wt_n"], p["bt"])
    hs = _sage_mean(x, adj, p["ws_r"], p["ws_n"], p["bs"])
    st = jnp.sum(ht * p["att"][0], axis=-1, keepdims=True)
    ss = jnp.sum(hs * p["att"][1], axis=-1, keepdims=True)
    w = jax.nn.softmax(jnp.concatenate([st, ss], axis=-1), axis=-1)
    return w[:, :1] * ht + w[:, 1:] * hs


def _reference_forward(x, edge_index, params):
    adj = build_mean_adjacency(edge_index, x.shape[0])
    h = jnp.maximum(_attention_le_conv_ref(x, adj, params[0]), 0.0)
    return _attention_le_conv_ref(h, adj, params[1])


if __name__ == "__main__":
    key = jax.random.PRNGKey(0)
    k_x, k_e, k_p = jax.random.split(key, 3)

    in_channels = 32
    out_channels = 64
    num_nodes = 64
    num_edges = 256

    x = jax.random.normal(k_x, (num_nodes, in_channels), jnp.float32)
    edge_index = jax.random.randint(k_e, (2, num_edges), 0, num_nodes, jnp.int32)
    params = init_attention_le_encoder_params(k_p, in_channels, out_channels)

    out = attention_le_encoder_forward(x, edge_index, params)
    out = jax.block_until_ready(out)

    ref = _reference_forward(x, edge_index, params)
    assert out.shape == (num_nodes, out_channels)
    # bf16 MXU operands with f32 accumulation -> loose-ish tolerance vs f32 ref
    assert jnp.allclose(out, ref, atol=3e-2, rtol=3e-2), \
        float(jnp.max(jnp.abs(out - ref)))

    print("KERNEL_OK")
</pallas_src>

<mosaic_0001>
module attributes {stable_mosaic.version = 11 : i64} {
  func.func @_attention_le_conv_kernel(%arg0: i32, %arg1: i32, %arg2: memref<1x1xi32, #tpu.memory_space<smem>>, %arg3: memref<1xi32, #tpu.memory_space<smem>>, %arg4: memref<64x64xi8, #tpu.memory_space<vmem>>, %arg5: memref<64x32xbf16, #tpu.memory_space<vmem>>, %arg6: memref<64x32xbf16, #tpu.memory_space<vmem>>, %arg7: memref<64x1xf32, #tpu.memory_space<vmem>>, %arg8: memref<32x256xbf16, #tpu.memory_space<vmem>>, %arg9: memref<32x256xbf16, #tpu.memory_space<vmem>>, %arg10: memref<1x256xf32, #tpu.memory_space<vmem>>, %arg11: memref<1x256xf32, #tpu.memory_space<vmem>>, %arg12: memref<64x128xbf16, #tpu.memory_space<vmem>>, %arg13: memref<64x32xf32, #tpu.memory_space<vmem>>) attributes {dimension_semantics = [#tpu.dimension_semantics<parallel>, #tpu.dimension_semantics<arbitrary>], iteration_bounds = array<i64: 1, 1>, scalar_prefetch = 2 : i64, scratch_operands = 1 : i64, tpu.core_type = #tpu.core_type<tc>, window_params = [{transform_indices = @transform_0, window_bounds = array<i64: 64, 64>}, {transform_indices = @transform_1, window_bounds = array<i64: 64, 32>}, {transform_indices = @transform_2, window_bounds = array<i64: 64, 32>}, {transform_indices = @transform_3, window_bounds = array<i64: 64, 1>}, {pipeline_mode = #tpu.pipeline_mode<synchronous>, transform_indices = @transform_4, window_bounds = array<i64: 32, 256>}, {pipeline_mode = #tpu.pipeline_mode<synchronous>, transform_indices = @transform_5, window_bounds = array<i64: 32, 256>}, {pipeline_mode = #tpu.pipeline_mode<synchronous>, transform_indices = @transform_6, window_bounds = array<i64: 1, 256>}, {pipeline_mode = #tpu.pipeline_mode<synchronous>, transform_indices = @transform_7, window_bounds = array<i64: 1, 256>}, {transform_indices = @transform_8, window_bounds = array<i64: 64, 128>}]} {
    %c0_i32 = arith.constant 0 : i32
    %0 = arith.cmpi eq, %arg1, %c0_i32 : i32
    %1 = arith.extui %0 : i1 to i32
    %c0_i32_0 = arith.constant 0 : i32
    %2 = arith.cmpi ne, %1, %c0_i32_0 : i32
    scf.if %2 {
      %cst = arith.constant 0.000000e+00 : f32
      %11 = vector.broadcast %cst : f32 to vector<64x32xf32>
      %c0 = arith.constant 0 : index
      %c0_4 = arith.constant 0 : index
      %12 = vector.load %arg13[%c0, %c0_4] : memref<64x32xf32, #tpu.memory_space<vmem>>, vector<64x32xf32>
      tpu.vector_store %arg13[%c0, %c0_4], %11 {strides = array<i32>} : memref<64x32xf32, #tpu.memory_space<vmem>>, vector<64x32xf32>,
    } else {
    }
    %3 = arith.index_cast %arg0 : i32 to index
    %4 = memref.load %arg3[%3] : memref<1xi32, #tpu.memory_space<smem>>
    %5 = arith.cmpi slt, %arg1, %4 : i32
    %6 = arith.extui %5 : i1 to i32
    %c0_i32_1 = arith.constant 0 : i32
    %7 = arith.cmpi ne, %6, %c0_i32_1 : i32
    scf.if %7 {
      %c0 = arith.constant 0 : index
      %c0_4 = arith.constant 0 : index
      %11 = vector.load %arg4[%c0, %c0_4] : memref<64x64xi8, #tpu.memory_space<vmem>>, vector<64x64xi8>
      %12 = arith.sitofp %11 : vector<64x64xi8> to vector<64x64xbf16>
      %c0_5 = arith.constant 0 : index
      %c0_6 = arith.constant 0 : index
      %13 = vector.load %arg13[%c0_5, %c0_6] : memref<64x32xf32, #tpu.memory_space<vmem>>, vector<64x32xf32>
      %c0_7 = arith.constant 0 : index
      %c0_8 = arith.constant 0 : index
      %14 = vector.load %arg5[%c0_7, %c0_8] : memref<64x32xbf16, #tpu.memory_space<vmem>>, vector<64x32xbf16>
      %cst = arith.constant dense<0.000000e+00> : vector<64x32xf32>
      %15 = tpu.matmul %12, %14, %cst {dimension_numbers = #tpu.dot_dimension_numbers<[1], [0], [0], [1], [0, 0, 1, 1], [], []>} : vector<64x64xbf16>, vector<64x32xbf16>, vector<64x32xf32> -> vector<64x32xf32>
      %16 = arith.addf %13, %15 : vector<64x32xf32>
      %c0_9 = arith.constant 0 : index
      %c0_10 = arith.constant 0 : index
      %17 = vector.load %arg13[%c0_9, %c0_10] : memref<64x32xf32, #tpu.memory_space<vmem>>, vector<64x32xf32>
      tpu.vector_store %arg13[%c0_9, %c0_10], %16 {strides = array<i32>} : memref<64x32xf32, #tpu.memory_space<vmem>>, vector<64x32xf32>,
    } else {
    }
    %c0_i32_2 = arith.constant 0 : i32
    %8 = arith.cmpi eq, %arg1, %c0_i32_2 : i32
    %9 = arith.extui %8 : i1 to i32
    %c0_i32_3 = arith.constant 0 : i32
    %10 = arith.cmpi ne, %9, %c0_i32_3 : i32
    scf.if %10 {
      %c0 = arith.constant 0 : index
      %c0_4 = arith.constant 0 : index
      %11 = vector.load %arg13[%c0, %c0_4] : memref<64x32xf32, #tpu.memory_space<vmem>>, vector<64x32xf32>
      %c0_5 = arith.constant 0 : index
      %c0_6 = arith.constant 0 : index
      %12 = vector.load %arg7[%c0_5, %c0_6] : memref<64x1xf32, #tpu.memory_space<vmem>>, vector<64x1xf32>
      %13 = vector.broadcast %12 : vector<64x1xf32> to vector<64x32xf32>
      %14 = arith.mulf %11, %13 : vector<64x32xf32>
      %c0_7 = arith.constant 0 : index
      %c0_8 = arith.constant 0 : index
      %15 = vector.load %arg6[%c0_7, %c0_8] : memref<64x32xbf16, #tpu.memory_space<vmem>>, vector<64x32xbf16>
      %c0_9 = arith.constant 0 : index
      %c0_10 = arith.constant 0 : index
      %16 = vector.load %arg8[%c0_9, %c0_10] : memref<32x256xbf16, #tpu.memory_space<vmem>>, vector<32x256xbf16>
      %cst = arith.constant dense<0.000000e+00> : vector<64x256xf32>
      %17 = tpu.matmul %15, %16, %cst {dimension_numbers = #tpu.dot_dimension_numbers<[1], [0], [0], [1], [0, 0, 1, 1], [], []>} : vector<64x32xbf16>, vector<32x256xbf16>, vector<64x256xf32> -> vector<64x256xf32>
      %18 = arith.truncf %14 : vector<64x32xf32> to vector<64x32xbf16>
      %c0_11 = arith.constant 0 : index
      %c0_12 = arith.constant 0 : index
      %19 = vector.load %arg9[%c0_11, %c0_12] : memref<32x256xbf16, #tpu.memory_space<vmem>>, vector<32x256xbf16>
      %cst_13 = arith.constant dense<0.000000e+00> : vector<64x256xf32>
      %20 = tpu.matmul %18, %19, %cst_13 {dimension_numbers = #tpu.dot_dimension_numbers<[1], [0], [0], [1], [0, 0, 1, 1], [], []>} : vector<64x32xbf16>, vector<32x256xbf16>, vector<64x256xf32> -> vector<64x256xf32>
      %21 = arith.addf %17, %20 : vector<64x256xf32>
      %c0_14 = arith.constant 0 : index
      %c0_15 = arith.constant 0 : index
      %22 = vector.load %arg10[%c0_14, %c0_15] : memref<1x256xf32, #tpu.memory_space<vmem>>, vector<1x256xf32>
      %23 = vector.broadcast %22 : vector<1x256xf32> to vector<64x256xf32>
      %24 = arith.addf %21, %23 : vector<64x256xf32>
      %25 = vector.extract_strided_slice %24 {offsets = [0, 0], sizes = [64, 128], strides = [1, 1]} : vector<64x256xf32> to vector<64x128xf32>
      %26 = vector.extract_strided_slice %24 {offsets = [0, 128], sizes = [64, 128], strides = [1, 1]} : vector<64x256xf32> to vector<64x128xf32>
      %c0_16 = arith.constant 0 : index
      %c0_17 = arith.constant 0 : index
      %27 = vector.load %arg11[%c0_16, %c0_17] : memref<1x256xf32, #tpu.memory_space<vmem>>, vector<1x256xf32>
      %28 = vector.broadcast %27 : vector<1x256xf32> to vector<64x256xf32>
      %29 = arith.mulf %24, %28 : vector<64x256xf32>
      %30 = vector.extract_strided_slice %29 {offsets = [0, 0], sizes = [64, 128], strides = [1, 1]} : vector<64x256xf32> to vector<64x128xf32>
      %cst_18 = arith.constant dense<0.000000e+00> : vector<64xf32>
      %31 = vector.multi_reduction <add>, %30, %cst_18 [1] : vector<64x128xf32> to vector<64xf32>
      %32 = vector.shape_cast %31 : vector<64xf32> to vector<64x1xf32>
      %33 = vector.extract_strided_slice %29 {offsets = [0, 128], sizes = [64, 128], strides = [1, 1]} : vector<64x256xf32> to vector<64x128xf32>
      %cst_19 = arith.constant dense<0.000000e+00> : vector<64xf32>
      %34 = vector.multi_reduction <add>, %33, %cst_19 [1] : vector<64x128xf32> to vector<64xf32>
      %35 = vector.shape_cast %34 : vector<64xf32> to vector<64x1xf32>
      %36 = arith.maximumf %32, %35 : vector<64x1xf32>
      %37 = arith.subf %32, %36 : vector<64x1xf32>
      %38 = math.exp %37 : vector<64x1xf32>
      %39 = arith.subf %35, %36 : vector<64x1xf32>
      %40 = math.exp %39 : vector<64x1xf32>
      %41 = arith.addf %38, %40 : vector<64x1xf32>
      %42 = tpu.reciprocal %41 : vector<64x1xf32> -> vector<64x1xf32>
      %43 = vector.broadcast %38 : vector<64x1xf32> to vector<64x128xf32>
      %44 = arith.mulf %43, %25 : vector<64x128xf32>
      %45 = vector.broadcast %40 : vector<64x1xf32> to vector<64x128xf32>
      %46 = arith.mulf %45, %26 : vector<64x128xf32>
      %47 = arith.addf %44, %46 : vector<64x128xf32>
      %48 = vector.broadcast %42 : vector<64x1xf32> to vector<64x128xf32>
      %49 = arith.mulf %47, %48 : vector<64x128xf32>
      %cst_20 = arith.constant 0.000000e+00 : f32
      %50 = vector.broadcast %cst_20 : f32 to vector<64x128xf32>
      %51 = arith.maximumf %49, %50 : vector<64x128xf32>
      %52 = arith.truncf %51 : vector<64x128xf32> to vector<64x128xbf16>
      %c0_21 = arith.constant 0 : index
      %c0_22 = arith.constant 0 : index
      %53 = vector.load %arg12[%c0_21, %c0_22] : memref<64x128xbf16, #tpu.memory_space<vmem>>, vector<64x128xbf16>
      tpu.vector_store %arg12[%c0_21, %c0_22], %52 {strides = array<i32>} : memref<64x128xbf16, #tpu.memory_space<vmem>>, vector<64x128xbf16>,
    } else {
    }
    return
  }
  func.func @transform_0(%arg0: i32, %arg1: i32, %arg2: memref<1x1xi32, #tpu.memory_space<smem>>, %arg3: memref<1xi32, #tpu.memory_space<smem>>) -> (i32, i32) {
    %0 = arith.index_cast %arg0 : i32 to index
    %1 = arith.index_cast %arg1 : i32 to index
    %2 = memref.load %arg2[%0, %1] : memref<1x1xi32, #tpu.memory_space<smem>>
    %c0_i32 = arith.constant 0 : i32
    return %arg0, %2 : i32, i32
  }
  func.func @transform_1(%arg0: i32, %arg1: i32, %arg2: memref<1x1xi32, #tpu.memory_space<smem>>, %arg3: memref<1xi32, #tpu.memory_space<smem>>) -> (i32, i32) {
    %0 = arith.index_cast %arg0 : i32 to index
    %1 = arith.index_cast %arg1 : i32 to index
    %2 = memref.load %arg2[%0, %1] : memref<1x1xi32, #tpu.memory_space<smem>>
    %c0_i32 = arith.constant 0 : i32
    %c0_i32_0 = arith.constant 0 : i32
    return %2, %c0_i32 : i32, i32
  }
  func.func @transform_2(%arg0: i32, %arg1: i32, %arg2: memref<1x1xi32, #tpu.memory_space<smem>>, %arg3: memref<1xi32, #tpu.memory_space<smem>>) -> (i32, i32) {
    %c0_i32 = arith.constant 0 : i32
    %c0_i32_0 = arith.constant 0 : i32
    return %arg0, %c0_i32 : i32, i32
  }
  func.func @transform_3(%arg0: i32, %arg1: i32, %arg2: memref<1x1xi32, #tpu.memory_space<smem>>, %arg3: memref<1xi32, #tpu.memory_space<smem>>) -> (i32, i32) {
    %c0_i32 = arith.constant 0 : i32
    %c0_i32_0 = arith.constant 0 : i32
    return %arg0, %c0_i32 : i32, i32
  }
  func.func @transform_4(%arg0: i32, %arg1: i32, %arg2: memref<1x1xi32, #tpu.memory_space<smem>>, %arg3: memref<1xi32, #tpu.memory_space<smem>>) -> (i32, i32) {
    %c0_i32 = arith.constant 0 : i32
    %c0_i32_0 = arith.constant 0 : i32
    %c0_i32_1 = arith.constant 0 : i32
    return %c0_i32, %c0_i32_0 : i32, i32
  }
  func.func @transform_5(%arg0: i32, %arg1: i32, %arg2: memref<1x1xi32, #tpu.memory_space<smem>>, %arg3: memref<1xi32, #tpu.memory_space<smem>>) -> (i32, i32) {
    %c0_i32 = arith.constant 0 : i32
    %c0_i32_0 = arith.constant 0 : i32
    %c0_i32_1 = arith.constant 0 : i32
    return %c0_i32, %c0_i32_0 : i32, i32
  }
  func.func @transform_6(%arg0: i32, %arg1: i32, %arg2: memref<1x1xi32, #tpu.memory_space<smem>>, %arg3: memref<1xi32, #tpu.memory_space<smem>>) -> (i32, i32) {
    %c0_i32 = arith.constant 0 : i32
    %c0_i32_0 = arith.constant 0 : i32
    %c0_i32_1 = arith.constant 0 : i32
    return %c0_i32, %c0_i32_0 : i32, i32
  }
  func.func @transform_7(%arg0: i32, %arg1: i32, %arg2: memref<1x1xi32, #tpu.memory_space<smem>>, %arg3: memref<1xi32, #tpu.memory_space<smem>>) -> (i32, i32) {
    %c0_i32 = arith.constant 0 : i32
    %c0_i32_0 = arith.constant 0 : i32
    %c0_i32_1 = arith.constant 0 : i32
    return %c0_i32, %c0_i32_0 : i32, i32
  }
  func.func @transform_8(%arg0: i32, %arg1: i32, %arg2: memref<1x1xi32, #tpu.memory_space<smem>>, %arg3: memref<1xi32, #tpu.memory_space<smem>>) -> (i32, i32) {
    %c0_i32 = arith.constant 0 : i32
    %c0_i32_0 = arith.constant 0 : i32
    return %arg0, %c0_i32 : i32, i32
  }
}

</mosaic_0001>

<bundles_post_ra>
// kernel: tpu_custom_call.1
= control target key start
LH: loop header
LB: loop body
LE: loop exit
PB: predicated region body
PF: predicated region fallthrough
CT: control target
= control target key end

     0   :  { %17 = vsyncpa [#allocation7], 0  ;;  %vm108_vm0 = vcmask 261120   ;;  %v1091_v0 = vmov 0.0   ;;  %s1476_s0 = inlined_call_operand.<no memory space> [shape: s32[1,1], index: 0, kind: input, shape index: {}]   ;;  %s1477_s1 = inlined_call_operand.<no memory space> [shape: s32[1], index: 1, kind: input, shape index: {}]   ;;  %s1478_s2 = inlined_call_operand.vmem [shape: s8[64,64], index: 2, kind: input, shape index: {}]   ;;  %s1479_s3 = inlined_call_operand.vmem [shape: bf16[64,32], index: 3, kind: input, shape index: {}]   ;;  %s1480_s4 = inlined_call_operand.vmem [shape: bf16[64,32], index: 4, kind: input, shape index: {}]   ;;  %s1481_s5 = inlined_call_operand.vmem [shape: f32[64,1], index: 5, kind: input, shape index: {}]   ;;  %s1482_s6 = inlined_call_operand.vmem [shape: bf16[32,256], index: 6, kind: input, shape index: {}]   ;;  %s1483_s7 = inlined_call_operand.vmem [shape: bf16[32,256], index: 7, kind: input, shape index: {}]   ;;  %s1484_s8 = inlined_call_operand.vmem [shape: f32[1,256], index: 8, kind: input, shape index: {}]   ;;  %s1485_s9 = inlined_call_operand.vmem [shape: f32[1,256], index: 9, kind: input, shape index: {}]   ;;  %s1486_s10 = inlined_call_operand.hbm [shape: bf16[64,128], index: 10, kind: output, shape index: {}]  }
   0x1   :  { %p81_p0 = scmp.lt.s32.totalorder %s1476_s0, 0  ;;  %s870_s17 = sshll.u32 %s1476_s0, 3  ;;  %109 = vst.msk [vmem:[#allocation2] sm:$0xff] %vm108_vm0, %v1091_v0 }
   0x2   :  { %p94_p1 = scmp.lt.s32.totalorder %s870_s17, 7  ;;  %110 = vst.msk [vmem:[#allocation2 + $0x8] sm:$0xff] %vm108_vm0, %v1091_v0  ;;  %p873_p2 = scmp.le.s32.totalorder %s1477_s1, 0 }
   0x3   :  { %s1496_s0 = smov (!%p81_p0, %s1476_s0), 0  ;;  %111 = vst.msk [vmem:[#allocation2 + $0x10] sm:$0xff] %vm108_vm0, %v1091_v0 }
   0x4   :  { %s1498_s17 = smov (!%p94_p1, %s870_s17), 7  ;;  %s869_s20 = sshll.u32 %s1496_s0, 3  ;;  %112 = vst.msk [vmem:[#allocation2 + $0x18] sm:$0xff] %vm108_vm0, %v1091_v0 }
   0x5   :  { %s84_s23 = scalar_lea.vmem %s1478_s2, %s869_s20  ;;  %s871_s24 = sshll.u32 %s1498_s17, 2  ;;  %113 = vst.msk [vmem:[#allocation2 + $0x20] sm:$0xff] %vm108_vm0, %v1091_v0 }
   0x6   :  { %s1171_s27 = scalar_lea.vmem %s1479_s3, %s871_s24  ;;  %114 = vst.msk [vmem:[#allocation2 + $0x28] sm:$0xff] %vm108_vm0, %v1091_v0  ;;  %121 = sbr.rel (%p873_p2) target bundleno = 172 (0xac), region = 41 }
   0x7   :  { %115 = vst.msk [vmem:[#allocation2 + $0x30] sm:$0xff] %vm108_vm0, %v1091_v0 }
   0x8   :  { %116 = vst.msk [vmem:[#allocation2 + $0x38] sm:$0xff] %vm108_vm0, %v1091_v0 }
   0xb   :  { %v961_v1 = vld [vmem:[%s1171_s27 + $0x18] sm:$0xff]  ;;  %v960_v2 = vld [vmem:[%s1171_s27 + $0x10] sm:$0xff]  ;;  %v122_v3 = vld [vmem:[%s84_s23] sm:$0xff]  ;;  %vm184_vm1 = vcmask 523264  }
   0xc   :  { %201 = vmatpush.bf16.msra.mxu0 %v961_v1  ;;  %997 = vmatpush.bf16.msra.mxu1 %v961_v1  ;;  %v123_v4 = vld [vmem:[%s84_s23 + $0x8] sm:$0xff]  ;;  %v124_v5 = vunpack.c.0.s8 %v122_v3  ;;  %v125_v6 = vunpack.c.1.s8 %v122_v3  ;;  %v126_v7 = vunpack.c.2.s8 %v122_v3  ;;  %v127_v8 = vunpack.c.3.s8 %v122_v3  ;;  %v958_v18 = vld [vmem:[%s1171_s27] sm:$0xff]  ;;  %v146_v28 = vld [vmem:[#allocation2 + $0x10] sm:$0xff] }
   0xd   :  { %998 = vmatpush.bf16.msra.mxu2 %v961_v1  ;;  %999 = vmatpush.bf16.msra.mxu3 %v961_v1  ;;  %v959_v9 = vld [vmem:[%s1171_s27 + $0x8] sm:$0xff]  ;;  %v128_v10 = vunpack.c.0.s8 %v123_v4  ;;  %v129_v11 = vunpack.c.1.s8 %v123_v4  ;;  %v130_v12 = vunpack.c.2.s8 %v123_v4  ;;  %v131_v13 = vunpack.c.3.s8 %v123_v4  ;;  %v144_v27 = vld [vmem:[#allocation2] sm:$0xff]  ;;  %v147_v36 = vld [vmem:[#allocation2 + $0x18] sm:$0xff] }
   0xe   :  { %v132_v14 = vcvt.s32.f32 %v124_v5  ;;  %v133_v15 = vcvt.s32.f32 %v125_v6  ;;  %v134_v16 = vcvt.s32.f32 %v126_v7  ;;  %v135_v17 = vcvt.s32.f32 %v127_v8  ;;  %v148_v33 = vld [vmem:[#allocation2 + $0x20] sm:$0xff]  ;;  %v150_v34 = vld [vmem:[#allocation2 + $0x30] sm:$0xff]  ;;  %v145_v35 = vld [vmem:[#allocation2 + $0x8] sm:$0xff] }
   0xf   :  { %v136_v19 = vcvt.s32.f32 %v128_v10  ;;  %v137_v20 = vcvt.s32.f32 %v129_v11  ;;  %v138_v21 = vcvt.s32.f32 %v130_v12  ;;  %v139_v22 = vcvt.s32.f32 %v131_v13  ;;  %v149_v45 = vld [vmem:[#allocation2 + $0x28] sm:$0xff]  ;;  %v151_v46 = vld [vmem:[#allocation2 + $0x38] sm:$0xff] }
  0x10   :  { %202 = vmatpush.bf16.msra.mxu0 %v960_v2  ;;  %1000 = vmatpush.bf16.msra.mxu1 %v960_v2  ;;  %v140_v23 = vpack.c.bf16 %v133_v15, %v132_v14  ;;  %v141_v24 = vpack.c.bf16 %v135_v17, %v134_v16 }
  0x11   :  { %1001 = vmatpush.bf16.msra.mxu2 %v960_v2  ;;  %1002 = vmatpush.bf16.msra.mxu3 %v960_v2  ;;  %v142_v25 = vpack.c.bf16 %v137_v20, %v136_v19  ;;  %v143_v26 = vpack.c.bf16 %v139_v22, %v138_v21 }
  0x14   :  { %203 = vmatpush.bf16.msra.mxu0 %v959_v9  ;;  %1003 = vmatpush.bf16.msra.mxu1 %v959_v9 }
  0x15   :  { %1004 = vmatpush.bf16.msra.mxu2 %v959_v9  ;;  %1005 = vmatpush.bf16.msra.mxu3 %v959_v9 }
  0x18   :  { %204 = vmatpush.bf16.msra.mxu0 %v958_v18  ;;  %1006 = vmatpush.bf16.msra.mxu1 %v958_v18 }
  0x19   :  { %1007 = vmatpush.bf16.msra.mxu2 %v958_v18  ;;  %1008 = vmatpush.bf16.msra.mxu3 %v958_v18 }
  0x1b   :  { %890 = vmatmul.msk.bf16.vlgmr.msra.gmra.mxu0 %vm184_vm1, %v140_v23  ;;  %891 = vmatmul.msk.bf16.vlgmr.msra.gmra.mxu1 %vm184_vm1, %v141_v24 }
  0x1c   :  { %892 = vmatmul.msk.bf16.vlgmr.msra.gmra.mxu2 %vm184_vm1, %v142_v25  ;;  %893 = vmatmul.msk.bf16.vlgmr.msra.gmra.mxu3 %vm184_vm1, %v143_v26 }
  0x98   :  { %v206_v29 = vpop.f32.mrf.mxu0  ;;  %v211_v30 = vpop.f32.mrf.mxu1 }
  0x99   :  { %v226_v31 = vadd.f32 %v206_v29, %v144_v27  ;;  %v228_v32 = vadd.f32 %v211_v30, %v146_v28 }
  0x9b   :  { %235 = vst.msk [vmem:[#allocation2] sm:$0xff] %vm108_vm0, %v226_v31 }
  0x9c   :  { %237 = vst.msk [vmem:[#allocation2 + $0x10] sm:$0xff] %vm108_vm0, %v228_v32 }
  0x9f   :  { %v216_v37 = vpop.f32.mrf.mxu2  ;;  %v221_v38 = vpop.f32.mrf.mxu3 }
  0xa0   :  { %v230_v39 = vadd.f32 %v216_v37, %v148_v33  ;;  %v232_v40 = vadd.f32 %v221_v38, %v150_v34  ;;  %v208_v41 = vpop.f32.mrf.mxu0  ;;  %v213_v42 = vpop.f32.mrf.mxu1 }
  0xa1   :  { %v227_v43 = vadd.f32 %v208_v41, %v145_v35  ;;  %v229_v44 = vadd.f32 %v213_v42, %v147_v36 }
  0xa2   :  { %239 = vst.msk [vmem:[#allocation2 + $0x20] sm:$0xff] %vm108_vm0, %v230_v39 }
  0xa3   :  { %241 = vst.msk [vmem:[#allocation2 + $0x30] sm:$0xff] %vm108_vm0, %v232_v40 }
  0xa4   :  { %236 = vst.msk [vmem:[#allocation2 + $0x8] sm:$0xff] %vm108_vm0, %v227_v43 }
  0xa5   :  { %238 = vst.msk [vmem:[#allocation2 + $0x18] sm:$0xff] %vm108_vm0, %v229_v44 }
  0xa7   :  { %v218_v47 = vpop.f32.mrf.mxu2  ;;  %v223_v48 = vpop.f32.mrf.mxu3 }
  0xa8   :  { %v231_v49 = vadd.f32 %v218_v47, %v149_v45  ;;  %v233_v50 = vadd.f32 %v223_v48, %v151_v46 }
  0xaa   :  { %240 = vst.msk [vmem:[#allocation2 + $0x28] sm:$0xff] %vm108_vm0, %v231_v49 }
  0xab   :  { %242 = vst.msk [vmem:[#allocation2 + $0x38] sm:$0xff] %vm108_vm0, %v233_v50 }
  0xac PF:  { %v256_v51 = vld [vmem:[%s1481_s5 + $0x10] sm:$0xff]  ;;  %v254_v52 = vld [vmem:[%s1481_s5] sm:$0xff]  ;;  %v1092_v53 = vmov 0   ;;  %v969_v56 = vld [vmem:[%s1482_s6 + $0x14] sm:$0xf0]  ;;  %s845_s16 = sshll.u32 %s1486_s10, 4  ;;  %s846_s16 = int_to_ptr.hbm [resolvable:$true] %s845_s16 }
  0xad   :  { %1015 = vset.pattern.permute.xlu1 %v1092_v53  ;;  %1014 = vset.pattern.permute.xlu0 %v1092_v53  ;;  %v258_v54 = vld [vmem:[%s1481_s5 + $0x20] sm:$0xff]  ;;  %v944_v55 = vld [vmem:[%s1482_s6 + $0x10] sm:$0xf]  ;;  %v967_v59 = vld [vmem:[%s1482_s6 + $0x4] sm:$0xf0]  ;;  %s1094_s17 = smov 64  }
  0xae   :  { %274 = vperm.xlu1 %1015, %v256_v51   ;;  %264 = vperm.xlu0 %1014, %v254_v52   ;;  %v936_v57 = vld [vmem:[%s1482_s6] sm:$0xf]  ;;  %v945_v58 = vor.u32 %v969_v56, %v944_v55  ;;  %v968_v60 = vld [vmem:[%s1482_s6 + $0x14] sm:$0xf]  ;;  %v946_v61 = vld [vmem:[%s1482_s6 + $0x18] sm:$0xf0] }
  0xaf   :  { %1016 = vset.pattern.permute.xlu2 %v1092_v53  ;;  %v949_v62 = vor.u32 %v968_v60, %v946_v61  ;;  %v257_v63 = vld [vmem:[%s1481_s5 + $0x18] sm:$0xff]  ;;  %v255_v0 = vld [vmem:[%s1481_s5 + $0x8] sm:$0xff]  ;;  %v937_v1 = vor.u32 %v967_v59, %v936_v57  ;;  %v962_v3 = vld [vmem:[%s1480_s4] sm:$0xff]  ;;  %s1095_s18 = smov 4  }
  0xb0   :  { %284 = vperm.xlu2 %1016, %v258_v54   ;;  %479 = vmatpush.bf16.msra.mxu2 %v945_v58  ;;  %v259_v2 = vld [vmem:[%s1481_s5 + $0x28] sm:$0xff]  ;;  %v261_v4 = vld [vmem:[%s1481_s5 + $0x38] sm:$0xff]  ;;  %v260_v5 = vld [vmem:[%s1481_s5 + $0x30] sm:$0xff] }
  0xb1   :  { %508 = vmatpush.bf16.msra.mxu3 %v949_v62  ;;  %v966_v6 = vld [vmem:[%s1482_s6 + $0x4] sm:$0xf]  ;;  %v938_v7 = vld [vmem:[%s1482_s6 + $0x8] sm:$0xf0]  ;;  %v904_v8 = vld [vmem:[%s1483_s7 + $0x10] sm:$0xf] }
  0xb2   :  { %v941_v9 = vor.u32 %v966_v6, %v938_v7  ;;  %v973_v10 = vld [vmem:[%s1483_s7 + $0x14] sm:$0xf0]  ;;  %v972_v11 = vld [vmem:[%s1483_s7 + $0x14] sm:$0xf]  ;;  %v906_v12 = vld [vmem:[%s1483_s7 + $0x18] sm:$0xf0] }
  0xb3   :  { %v905_v13 = vor.u32 %v973_v10, %v904_v8  ;;  %v909_v14 = vor.u32 %v972_v11, %v906_v12  ;;  %v896_v15 = vld [vmem:[%s1483_s7] sm:$0xf]  ;;  %v971_v16 = vld [vmem:[%s1483_s7 + $0x4] sm:$0xf0]  ;;  %v970_v17 = vld [vmem:[%s1483_s7 + $0x4] sm:$0xf] }
  0xb4   :  { %480 = vmatpush.bf16.msra.mxu2 %v937_v1  ;;  %v897_v18 = vor.u32 %v971_v16, %v896_v15  ;;  %v898_v19 = vld [vmem:[%s1483_s7 + $0x8] sm:$0xf0]  ;;  %v964_v22 = vld [vmem:[%s1480_s4 + $0x10] sm:$0xff]  ;;  %v246_v24 = vld [vmem:[#allocation2] sm:$0xff] }
  0xb5   :  { %509 = vmatpush.bf16.msra.mxu3 %v941_v9  ;;  %369 = vmatpush.bf16.msra.mxu0 %v905_v13  ;;  %v901_v20 = vor.u32 %v970_v17, %v898_v19  ;;  %v963_v21 = vld [vmem:[%s1480_s4 + $0x8] sm:$0xff]  ;;  %v965_v31 = vld [vmem:[%s1480_s4 + $0x18] sm:$0xff]  ;;  %v248_v32 = vld [vmem:[#allocation2 + $0x10] sm:$0xff] }
  0xb6   :  { %279 = vperm.xlu1 %1015, %v257_v63   ;;  %269 = vperm.xlu0 %1014, %v255_v0   ;;  %v247_v25 = vld [vmem:[#allocation2 + $0x8] sm:$0xff]  ;;  %v249_v33 = vld [vmem:[#allocation2 + $0x18] sm:$0xff]  ;;  %v250_v39 = vld [vmem:[#allocation2 + $0x20] sm:$0xff] }
  0xb7   :  { %950 = vmatmul.msk.bf16.vlgmr.msra.gmra.mxu2 %vm108_vm0, %v962_v3  ;;  %398 = vmatpush.bf16.msra.mxu1 %v909_v14  ;;  %v251_v41 = vld [vmem:[#allocation2 + $0x28] sm:$0xff]  ;;  %v253_v46 = vld [vmem:[#allocation2 + $0x38] sm:$0xff]  ;;  %v252_v48 = vld [vmem:[#allocation2 + $0x30] sm:$0xff] }
  0xb8   :  { %289 = vperm.xlu2 %1016, %v259_v2   ;;  %954 = vmatmul.msk.bf16.vlgmr.msra.gmra.mxu3 %vm108_vm0, %v962_v3  ;;  %v531_v56 = vld [vmem:[%s1484_s8] sm:$0x3]  ;;  %s1093_s8 = smov [#allocation6]  }
  0xb9   :  { %370 = vmatpush.bf16.msra.mxu0 %v897_v18  ;;  %v553_v57 = vld [vmem:[%s1485_s9] sm:$0x3]  ;;  %v1297_v58 = vperm.slane %v531_v56, 0  ;;  %v1299_v59 = vperm.slane %v531_v56, 1  ;;  %s843_s9 = sshll.u32 %s1093_s8, 4  ;;  %s844_s9 = int_to_ptr.vmem [resolvable:$true] %s843_s9 }
  0xba   :  { %v1301_v0 = vperm.slane %v553_v57, 1  ;;  %v1303_v1 = vperm.slane %v553_v57, 0 }
  0xbb   :  { %399 = vmatpush.bf16.msra.mxu1 %v901_v20 }
  0xbe   :  { %299 = vperm.xlu1 %1015, %v261_v4   ;;  %294 = vperm.xlu0 %1014, %v260_v5  }
  0xc7   :  { %951 = vmatmul.msk.bf16.gmra.mxu2 %vm108_vm0, %v963_v21 }
  0xc8   :  { %955 = vmatmul.msk.bf16.gmra.mxu3 %vm108_vm0, %v963_v21 }
  0xd7   :  { %952 = vmatmul.msk.bf16.gmra.mxu2 %vm108_vm0, %v964_v22 }
  0xd8   :  { %956 = vmatmul.msk.bf16.gmra.mxu3 %vm108_vm0, %v964_v22 }
  0xe7   :  { %953 = vmatmul.msk.bf16.gmra.mxu2 %vm108_vm0, %v965_v31 }
  0xe8   :  { %957 = vmatmul.msk.bf16.gmra.mxu3 %vm108_vm0, %v965_v31 }
 0x10a   :  { %v285_v37 = vpop.permute.xlu2 %284 }
 0x10b   :  { %v306_v42 = vmul.f32 %v285_v37, %v250_v39 }
 0x112   :  { %v290_v40 = vpop.permute.xlu2 %289 }
 0x113   :  { %v307_v43 = vmul.f32 %v290_v40, %v251_v41 }
 0x115   :  { %v324_v44 = vpack.c.bf16 %v307_v43, %v306_v42 }
 0x120   :  { %v265_v23 = vpop.permute.xlu0 %264  ;;  %v275_v30 = vpop.permute.xlu1 %274 }
 0x121   :  { %v302_v27 = vmul.f32 %v265_v23, %v246_v24  ;;  %v304_v35 = vmul.f32 %v275_v30, %v248_v32 }
 0x128   :  { %v270_v26 = vpop.permute.xlu0 %269  ;;  %v280_v34 = vpop.permute.xlu1 %279 }
 0x129   :  { %v303_v28 = vmul.f32 %v270_v26, %v247_v25  ;;  %v305_v36 = vmul.f32 %v280_v34, %v249_v33 }
 0x12b   :  { %v322_v29 = vpack.c.bf16 %v303_v28, %v302_v27  ;;  %v323_v38 = vpack.c.bf16 %v305_v36, %v304_v35 }
 0x12d   :  { %910 = vmatmul.msk.bf16.vlgmr.msra.gmra.mxu0 %vm108_vm0, %v322_v29  ;;  %914 = vmatmul.msk.bf16.vlgmr.msra.gmra.mxu1 %vm108_vm0, %v322_v29 }
 0x130   :  { %v300_v45 = vpop.permute.xlu1 %299  ;;  %v295_v47 = vpop.permute.xlu0 %294 }
 0x131   :  { %v309_v49 = vmul.f32 %v300_v45, %v253_v46  ;;  %v308_v50 = vmul.f32 %v295_v47, %v252_v48 }
 0x133   :  { %v325_v51 = vpack.c.bf16 %v309_v49, %v308_v50 }
 0x13a   :  { %v482_v53 = vpop.f32.mrf.mxu2 }
 0x13b   :  { %v511_v52 = vpop.f32.mrf.mxu3 }
 0x13d   :  { %911 = vmatmul.msk.bf16.gmra.mxu0 %vm108_vm0, %v323_v38  ;;  %915 = vmatmul.msk.bf16.gmra.mxu1 %vm108_vm0, %v323_v38 }
 0x142   :  { %v484_v55 = vpop.f32.mrf.mxu2 }
 0x143   :  { %v513_v54 = vpop.f32.mrf.mxu3 }
 0x14a   :  { %v487_v7 = vpop.f32.mrf.mxu2 }
 0x14b   :  { %v516_v4 = vpop.f32.mrf.mxu3 }
 0x14d   :  { %912 = vmatmul.msk.bf16.gmra.mxu0 %vm108_vm0, %v324_v44  ;;  %916 = vmatmul.msk.bf16.gmra.mxu1 %vm108_vm0, %v324_v44 }
 0x152   :  { %v489_v17 = vpop.f32.mrf.mxu2 }
 0x153   :  { %v518_v16 = vpop.f32.mrf.mxu3 }
 0x15a   :  { %v492_v30 = vpop.f32.mrf.mxu2 }
 0x15b   :  { %v521_v26 = vpop.f32.mrf.mxu3 }
 0x15d   :  { %913 = vmatmul.msk.bf16.gmra.mxu0 %vm108_vm0, %v325_v51  ;;  %917 = vmatmul.msk.bf16.gmra.mxu1 %vm108_vm0, %v325_v51 }
 0x162   :  { %v494_v42 = vpop.f32.mrf.mxu2 }
 0x163   :  { %v523_v40 = vpop.f32.mrf.mxu3 }
 0x16a   :  { %v497_v51 = vpop.f32.mrf.mxu2 }
 0x16b   :  { %v526_v50 = vpop.f32.mrf.mxu3 }
 0x1aa   :  { %v372_v60 = vpop.f32.mrf.mxu0  ;;  %v401_v61 = vpop.f32.mrf.mxu1 }
 0x1ab   :  { %v483_v62 = vadd.f32 %v482_v53, %v372_v60  ;;  %v512_v63 = vadd.f32 %v511_v52, %v401_v61 }
 0x1ad   :  { %v1306_v2 = vadd.f32 %v1297_v58, %v483_v62  ;;  %v1309_v3 = vadd.f32 %v1299_v59, %v512_v63  ;;  %v528_v63 = vpop.f32.mrf.mxu3 }
 0x1af   :  { %v560_v5 = vmul.f32 %v1301_v0, %v1309_v3  ;;  %v559_v6 = vmul.f32 %v1303_v1, %v1306_v2 }
 0x1b1   :  { %591 = vadd.xlane.f32.xlu0 %v560_v5  ;;  %575 = vadd.xlane.f32.xlu2 %v559_v6 }
 0x1b2   :  { %v374_v8 = vpop.f32.mrf.mxu0  ;;  %v403_v9 = vpop.f32.mrf.mxu1 }
 0x1b3   :  { %v485_v10 = vadd.f32 %v484_v55, %v374_v8  ;;  %v514_v11 = vadd.f32 %v513_v54, %v403_v9 }
 0x1b5   :  { %v1316_v12 = vadd.f32 %v1297_v58, %v485_v10  ;;  %v1319_v13 = vadd.f32 %v1299_v59, %v514_v11 }
 0x1b7   :  { %v562_v14 = vmul.f32 %v1301_v0, %v1319_v13  ;;  %v561_v15 = vmul.f32 %v1303_v1, %v1316_v12 }
 0x1b9   :  { %593 = vadd.xlane.f32.xlu1 %v562_v14  ;;  %577 = vadd.xlane.f32.xlu0 %v561_v15 }
 0x1ba   :  { %v377_v18 = vpop.f32.mrf.mxu0  ;;  %v406_v19 = vpop.f32.mrf.mxu1 }
 0x1bb   :  { %v488_v20 = vadd.f32 %v487_v7, %v377_v18  ;;  %v517_v21 = vadd.f32 %v516_v4, %v406_v19  ;;  %v499_v4 = vpop.f32.mrf.mxu2 }
 0x1bd   :  { %v1326_v22 = vadd.f32 %v1297_v58, %v488_v20  ;;  %v1329_v23 = vadd.f32 %v1299_v59, %v517_v21 }
 0x1bf   :  { %v564_v24 = vmul.f32 %v1301_v0, %v1329_v23  ;;  %v563_v25 = vmul.f32 %v1303_v1, %v1326_v22 }
 0x1c1   :  { %595 = vadd.xlane.f32.xlu2 %v564_v24  ;;  %579 = vadd.xlane.f32.xlu1 %v563_v25 }
 0x1c2   :  { %v379_v27 = vpop.f32.mrf.mxu0  ;;  %v408_v28 = vpop.f32.mrf.mxu1 }
 0x1c3   :  { %v490_v29 = vadd.f32 %v489_v17, %v379_v27  ;;  %v519_v31 = vadd.f32 %v518_v16, %v408_v28 }
 0x1c5   :  { %v1336_v32 = vadd.f32 %v1297_v58, %v490_v29  ;;  %v1339_v33 = vadd.f32 %v1299_v59, %v519_v31 }
 0x1c7   :  { %v566_v34 = vmul.f32 %v1301_v0, %v1339_v33  ;;  %v565_v35 = vmul.f32 %v1303_v1, %v1336_v32 }
 0x1c9   :  { %597 = vadd.xlane.f32.xlu0 %v566_v34  ;;  %581 = vadd.xlane.f32.xlu2 %v565_v35 }
 0x1ca   :  { %v382_v36 = vpop.f32.mrf.mxu0  ;;  %v411_v37 = vpop.f32.mrf.mxu1 }
 0x1cb   :  { %v493_v38 = vadd.f32 %v492_v30, %v382_v36  ;;  %v522_v39 = vadd.f32 %v521_v26, %v411_v37 }
 0x1cd   :  { %v1346_v41 = vadd.f32 %v1297_v58, %v493_v38  ;;  %v1349_v43 = vadd.f32 %v1299_v59, %v522_v39 }
 0x1cf   :  { %v568_v44 = vmul.f32 %v1301_v0, %v1349_v43  ;;  %v567_v45 = vmul.f32 %v1303_v1, %v1346_v41 }
 0x1d1   :  { %599 = vadd.xlane.f32.xlu1 %v568_v44  ;;  %583 = vadd.xlane.f32.xlu2 %v567_v45 }
 0x1d2   :  { %v384_v46 = vpop.f32.mrf.mxu0  ;;  %v413_v47 = vpop.f32.mrf.mxu1 }
 0x1d3   :  { %v495_v48 = vadd.f32 %v494_v42, %v384_v46  ;;  %v524_v11 = vadd.f32 %v523_v40, %v413_v47 }
 0x1d5   :  { %v1356_v49 = vadd.f32 %v1297_v58, %v495_v48  ;;  %v1381_v16 = vadd.f32 %v1299_v59, %v524_v11 }
 0x1d7   :  { %v569_v52 = vmul.f32 %v1303_v1, %v1356_v49  ;;  %v570_v17 = vmul.f32 %v1301_v0, %v1381_v16 }
 0x1d9   :  { %585 = vadd.xlane.f32.xlu0 %v569_v52 }
 0x1da   :  { %v387_v53 = vpop.f32.mrf.mxu0  ;;  %v416_v54 = vpop.f32.mrf.mxu1 }
 0x1db   :  { %v498_v55 = vadd.f32 %v497_v51, %v387_v53  ;;  %v527_v56 = vadd.f32 %v526_v50, %v416_v54 }
 0x1dd   :  { %v1361_v57 = vadd.f32 %v1297_v58, %v498_v55  ;;  %v1364_v60 = vadd.f32 %v1299_v59, %v527_v56 }
 0x1df   :  { %v572_v61 = vmul.f32 %v1301_v0, %v1364_v60  ;;  %v571_v62 = vmul.f32 %v1303_v1, %v1361_v57 }
 0x1e1   :  { %603 = vadd.xlane.f32.xlu0 %v572_v61  ;;  %587 = vadd.xlane.f32.xlu1 %v571_v62 }
 0x1e2   :  { %v389_v5 = vpop.f32.mrf.mxu0  ;;  %v418_v6 = vpop.f32.mrf.mxu1 }
 0x1e3   :  { %v500_v7 = vadd.f32 %v499_v4, %v389_v5  ;;  %v529_v8 = vadd.f32 %v528_v63, %v418_v6 }
 0x1e5   :  { %v1371_v9 = vadd.f32 %v1297_v58, %v500_v7  ;;  %v1374_v10 = vadd.f32 %v1299_v59, %v529_v8 }
 0x1e7   :  { %v574_v14 = vmul.f32 %v1301_v0, %v1374_v10  ;;  %v573_v15 = vmul.f32 %v1303_v1, %v1371_v9 }
 0x1e9   :  { %605 = vadd.xlane.f32.xlu1 %v574_v14  ;;  %589 = vadd.xlane.f32.xlu2 %v573_v15 }
 0x1f1   :  { %601 = vadd.xlane.f32.xlu2 %v570_v17 }
 0x224   :  { %v592_v58 = vpop.xlane.xlu0 %591  ;;  %v576_v18 = vpop.xlane.xlu2 %575 }
 0x225   :  { %v607_v19 = vmax.f32 %v576_v18, %v592_v58 }
 0x227   :  { %v615_v20 = vsub.f32 %v576_v18, %v607_v19  ;;  %v639_v21 = vsub.f32 %v592_v58, %v607_v19 }
 0x229   :  { %v623_v24 = vmul.f32 1.442695, %v615_v20  ;;  %v647_v25 = vmul.f32 1.442695, %v639_v21 }
 0x22b   :  { %1017 = vpow2.f32 %v623_v24 }
 0x22c   :  { %1019 = vpow2.f32 %v647_v25  ;;  %v594_v26 = vpop.xlane.xlu1 %593  ;;  %v578_v1 = vpop.xlane.xlu0 %577 }
 0x22d   :  { %v608_v27 = vmax.f32 %v578_v1, %v594_v26 }
 0x22f   :  { %v616_v28 = vsub.f32 %v578_v1, %v608_v27  ;;  %v640_v29 = vsub.f32 %v594_v26, %v608_v27 }
 0x231   :  { %v1018_v59 = vpop.eup %1017  ;;  %v625_v30 = vmul.f32 1.442695, %v616_v28  ;;  %v649_v31 = vmul.f32 1.442695, %v640_v29 }
 0x232   :  { %v1020_v34 = vpop.eup %1019  ;;  %v783_v15 = vmul.f32 %v1018_v59, %v1306_v2 }
 0x233   :  { %v663_v0 = vadd.f32 %v1020_v34, %v1018_v59  ;;  %1021 = vpow2.f32 %v625_v30  ;;  %v791_v19 = vmul.f32 %v1020_v34, %v1309_v3 }
 0x234   :  { %1023 = vpow2.f32 %v649_v31  ;;  %v596_v35 = vpop.xlane.xlu2 %595  ;;  %v580_v36 = vpop.xlane.xlu1 %579 }
 0x235   :  { %1025 = vrcp.f32 %v663_v0  ;;  %v609_v37 = vmax.f32 %v580_v36, %v596_v35  ;;  %v682_v61 = vand.u32 2147483648, %v663_v0  ;;  %vm676_vm3 = vweird.f32 %v663_v0 }
 0x236   :  { %v680_v8 = vand.u32 2147483647, %v663_v0  ;;  %v799_v30 = vadd.f32 %v791_v19, %v783_v15 }
 0x237   :  { %v617_v38 = vsub.f32 %v580_v36, %v609_v37  ;;  %v641_v39 = vsub.f32 %v596_v35, %v609_v37  ;;  %v683_v18 = vor.u32 1.1754944e-38, %v682_v61 }
 0x238   :  { %vm681_vm5 = vcmp.eq.f32.partialorder %v680_v8, 8.507059e+37 }
 0x239   :  { %v1022_v40 = vpop.eup %1021  ;;  %v627_v44 = vmul.f32 1.442695, %v617_v38  ;;  %v651_v45 = vmul.f32 1.442695, %v641_v39 }
 0x23a   :  { %v1024_v42 = vpop.eup %1023  ;;  %v784_v26 = vmul.f32 %v1022_v40, %v1316_v12 }
 0x23b   :  { %v1026_v46 = vpop.eup %1025  ;;  %v664_v47 = vadd.f32 %v1024_v42, %v1022_v40  ;;  %1027 = vpow2.f32 %v627_v44  ;;  %v792_v1 = vmul.f32 %v1024_v42, %v1319_v13 }
 0x23c   :  { %v672_v48 = vmul.f32 %v1026_v46, %v663_v0  ;;  %v598_v50 = vpop.xlane.xlu0 %597  ;;  %v582_v51 = vpop.xlane.xlu2 %581  ;;  %vm677_vm2 = vweird.f32 %v1026_v46 }
 0x23d   :  { %1029 = vrcp.f32 %v664_v47  ;;  %v610_v53 = vmax.f32 %v582_v51, %v598_v50  ;;  %vm1389_vm4 = vmor %vm676_vm3, %vm677_vm2  ;;  %v696_v25 = vand.u32 2147483648, %v664_v47  ;;  %v694_v27 = vand.u32 2147483647, %v664_v47 }
 0x23e   :  { %v673_v52 = vsub.f32 1.0, %v672_v48  ;;  %1031 = vpow2.f32 %v651_v45  ;;  %vm690_vm7 = vweird.f32 %v664_v47  ;;  %v800_v0 = vadd.f32 %v792_v1, %v784_v26 }
 0x23f   :  { %v618_v55 = vsub.f32 %v582_v51, %v610_v53  ;;  %v642_v56 = vsub.f32 %v598_v50, %v610_v53  ;;  %v697_v34 = vor.u32 1.1754944e-38, %v696_v25  ;;  %vm695_vm9 = vcmp.eq.f32.partialorder %v694_v27, 8.507059e+37 }
 0x240   :  { %v674_v54 = vmul.f32 %v1026_v46, %v673_v52 }
 0x241   :  { %v1385_v62 = vpop.eup %1027  ;;  %v629_v4 = vmul.f32 1.442695, %v618_v55  ;;  %v653_v5 = vmul.f32 1.442695, %v642_v56 }
 0x242   :  { %v675_v63 = vadd.f32 %v1026_v46, %v674_v54  ;;  %v785_v8 = vmul.f32 %v1385_v62, %v1326_v22 }
 0x243   :  { %v1030_v6 = vpop.eup %1029  ;;  %1033 = vpow2.f32 %v629_v4 }
 0x244   :  { %v1387_v7 = vpop.eup %1031  ;;  %v686_v11 = vmul.f32 %v1030_v6, %v664_v47  ;;  %1035 = vpow2.f32 %v653_v5  ;;  %v679_v58 = vsel %vm1389_vm4, %v1026_v46, %v675_v63  ;;  %v600_v21 = vpop.xlane.xlu1 %599  ;;  %vm691_vm6 = vweird.f32 %v1030_v6 }
 0x245   :  { %v1396_v17 = vadd.f32 %v1387_v7, %v1385_v62  ;;  %v584_v24 = vpop.xlane.xlu2 %583  ;;  %v684_v28 = vsel %vm681_vm5, %v683_v18, %v679_v58  ;;  %vm692_vm8 = vmor %vm690_vm7, %vm691_vm6 }
 0x246   :  { %v687_v20 = vsub.f32 1.0, %v686_v11  ;;  %v611_v29 = vmax.f32 %v584_v24, %v600_v21  ;;  %v807_v35 = vmul.f32 %v799_v30, %v684_v28  ;;  %v793_v11 = vmul.f32 %v1387_v7, %v1329_v23 }
 0x247   :  { %1037 = vrcp.f32 %v1396_v17  ;;  %v710_v53 = vand.u32 2147483648, %v1396_v17  ;;  %vm704_vm11 = vweird.f32 %v1396_v17  ;;  %v708_v63 = vand.u32 2147483647, %v1396_v17 }
 0x248   :  { %v688_v2 = vmul.f32 %v1030_v6, %v687_v20  ;;  %v619_v39 = vsub.f32 %v584_v24, %v611_v29  ;;  %v643_v44 = vsub.f32 %v600_v21, %v611_v29  ;;  %v815_v45 = vmax.f32 %v807_v35, 0.0 }
 0x249   :  { %v1034_v59 = vpop.eup %1033  ;;  %v711_v15 = vor.u32 1.1754944e-38, %v710_v53  ;;  %vm709_vm13 = vcmp.eq.f32.partialorder %v708_v63, 8.507059e+37  ;;  %v801_v26 = vadd.f32 %v793_v11, %v785_v8 }
 0x24a   :  { %v689_v31 = vadd.f32 %v1030_v6, %v688_v2  ;;  %v1036_v3 = vpop.eup %1035  ;;  %v631_v48 = vmul.f32 1.442695, %v619_v39  ;;  %v655_v51 = vmul.f32 1.442695, %v643_v44 }
 0x24b   :  { %v666_v13 = vadd.f32 %v1036_v3, %v1034_v59  ;;  %v794_v19 = vmul.f32 %v1036_v3, %v1339_v33 }
 0x24c   :  { %v693_v12 = vsel %vm692_vm8, %v1030_v6, %v689_v31  ;;  %v1404_v36 = vpop.xlane.xlu0 %585 }
 0x24d   :  { %v1038_v37 = vpop.eup %1037  ;;  %v698_v38 = vsel %vm695_vm9, %v697_v34, %v693_v12  ;;  %1039 = vrcp.f32 %v666_v13  ;;  %v724_v18 = vand.u32 2147483648, %v666_v13  ;;  %v722_v22 = vand.u32 2147483647, %v666_v13 }
 0x24e   :  { %v808_v40 = vmul.f32 %v800_v0, %v698_v38  ;;  %v700_v42 = vmul.f32 %v1038_v37, %v1396_v17  ;;  %vm705_vm10 = vweird.f32 %v1038_v37  ;;  %1041 = vpow2.f32 %v631_v48 }
 0x24f   :  { %vm1410_vm12 = vmor %vm704_vm11, %vm705_vm10  ;;  %1043 = vpow2.f32 %v655_v51  ;;  %v786_v17 = vmul.f32 %v1034_v59, %v1336_v32  ;;  %vm718_vm15 = vweird.f32 %v666_v13  ;;  %v725_v32 = vor.u32 1.1754944e-38, %v724_v18 }
 0x250   :  { %v816_v46 = vmax.f32 %v808_v40, 0.0  ;;  %v701_v47 = vsub.f32 1.0, %v700_v42  ;;  %vm723_vm1 = vcmp.eq.f32.partialorder %v722_v22, 8.507059e+37 }
 0x251   :  { %v802_v27 = vadd.f32 %v794_v19, %v786_v17 }
 0x252   :  { %v702_v50 = vmul.f32 %v1038_v37, %v701_v47  ;;  %v977_v52 = vpack.c.bf16 %v816_v46, %v815_v45 }
 0x253   :  { %v1040_v54 = vpop.eup %1039 }
 0x254   :  { %v703_v55 = vadd.f32 %v1038_v37, %v702_v50  ;;  %v604_v56 = vpop.xlane.xlu0 %603  ;;  %v588_v61 = vpop.xlane.xlu1 %587  ;;  %978 = vst [vmem:[#allocation6] sm:$0xff] %v977_v52   ;;  %v714_v4 = vmul.f32 %v1040_v54, %v666_v13  ;;  %vm719_vm14 = vweird.f32 %v1040_v54 }
 0x255   :  { %v613_v5 = vmax.f32 %v588_v61, %v604_v56  ;;  %v1422_v7 = vpop.eup %1041  ;;  %vm720_vm0 = vmor %vm718_vm15, %vm719_vm14 }
 0x256   :  { %v707_v14 = vsel %vm1410_vm12, %v1038_v37, %v703_v55  ;;  %v715_v58 = vsub.f32 1.0, %v714_v4  ;;  %v1424_v2 = vpop.eup %1043 }
 0x257   :  { %v621_v20 = vsub.f32 %v588_v61, %v613_v5  ;;  %v645_v21 = vsub.f32 %v604_v56, %v613_v5  ;;  %v712_v62 = vsel %vm709_vm13, %v711_v15, %v707_v14  ;;  %v1428_v34 = vadd.f32 %v1424_v2, %v1422_v7 }
 0x258   :  { %v716_v24 = vmul.f32 %v1040_v54, %v715_v58  ;;  %v809_v29 = vmul.f32 %v801_v26, %v712_v62 }
 0x259   :  { %v635_v25 = vmul.f32 1.442695, %v621_v20  ;;  %v659_v23 = vmul.f32 1.442695, %v645_v21  ;;  %v787_v20 = vmul.f32 %v1422_v7, %v1346_v41  ;;  %vm732_vm9 = vweird.f32 %v1428_v34 }
 0x25a   :  { %v717_v1 = vadd.f32 %v1040_v54, %v716_v24  ;;  %v817_v12 = vmax.f32 %v809_v29, 0.0 }
 0x25b   :  { %1045 = vpow2.f32 %v635_v25 }
 0x25c   :  { %v606_v33 = vpop.xlane.xlu1 %605  ;;  %v590_v28 = vpop.xlane.xlu2 %589  ;;  %v721_v59 = vsel %vm720_vm0, %v1040_v54, %v717_v1  ;;  %1047 = vpow2.f32 %v659_v23 }
 0x25d   :  { %v726_v30 = vsel %vm723_vm1, %v725_v32, %v721_v59  ;;  %v614_v31 = vmax.f32 %v590_v28, %v606_v33  ;;  %1049 = vrcp.f32 %v1428_v34 }
 0x25e   :  { %v810_v3 = vmul.f32 %v802_v27, %v726_v30 }
 0x25f   :  { %v622_v0 = vsub.f32 %v590_v28, %v614_v31  ;;  %v646_v35 = vsub.f32 %v606_v33, %v614_v31  ;;  %v736_v33 = vand.u32 2147483647, %v1428_v34 }
 0x260   :  { %v818_v13 = vmax.f32 %v810_v3, 0.0 }
 0x261   :  { %v1046_v37 = vpop.eup %1045  ;;  %v637_v38 = vmul.f32 1.442695, %v622_v0  ;;  %v661_v39 = vmul.f32 1.442695, %v646_v35  ;;  %vm737_vm13 = vcmp.eq.f32.partialorder %v736_v33, 8.507059e+37 }
 0x262   :  { %v1048_v40 = vpop.eup %1047  ;;  %v982_v42 = vpack.c.bf16 %v818_v13, %v817_v12  ;;  %v789_v22 = vmul.f32 %v1046_v37, %v1361_v57 }
 0x263   :  { %v669_v44 = vadd.f32 %v1048_v40, %v1046_v37  ;;  %1051 = vpow2.f32 %v637_v38  ;;  %v1433_v50 = vpop.eup %1049  ;;  %v797_v62 = vmul.f32 %v1048_v40, %v1364_v60  ;;  %v738_v60 = vand.u32 2147483648, %v1428_v34 }
 0x264   :  { %v602_v45 = vpop.xlane.xlu2 %601  ;;  %1053 = vpow2.f32 %v661_v39  ;;  %994 = vst [vmem:[#allocation6 + $0x8] sm:$0xff] %v982_v42   ;;  %v728_v63 = vmul.f32 %v1433_v50, %v1428_v34  ;;  %vm733_vm7 = vweird.f32 %v1433_v50 }
 0x265   :  { %v612_v46 = vmax.f32 %v1404_v36, %v602_v45  ;;  %1055 = vrcp.f32 %v669_v44  ;;  %v764_v58 = vand.u32 2147483647, %v669_v44  ;;  %v766_v17 = vand.u32 2147483648, %v669_v44  ;;  %vm1461_vm11 = vmor %vm732_vm9, %vm733_vm7 }
 0x266   :  { %v729_v8 = vsub.f32 1.0, %v728_v63  ;;  %vm760_vm3 = vweird.f32 %v669_v44  ;;  %v805_v29 = vadd.f32 %v797_v62, %v789_v22 }
 0x267   :  { %v620_v47 = vsub.f32 %v1404_v36, %v612_v46  ;;  %v644_v48 = vsub.f32 %v602_v45, %v612_v46  ;;  %vm765_vm5 = vcmp.eq.f32.partialorder %v764_v58, 8.507059e+37  ;;  %v767_v23 = vor.u32 1.1754944e-38, %v766_v17 }
 0x268   :  { %v730_v19 = vmul.f32 %v1433_v50, %v729_v8 }
 0x269   :  { %v633_v51 = vmul.f32 1.442695, %v620_v47  ;;  %v1052_v52 = vpop.eup %1051  ;;  %v657_v53 = vmul.f32 1.442695, %v644_v48 }
 0x26a   :  { %v1054_v54 = vpop.eup %1053  ;;  %v790_v1 = vmul.f32 %v1052_v52, %v1371_v9  ;;  %v731_v27 = vadd.f32 %v1433_v50, %v730_v19  ;;  %v795_v9 = vmul.f32 %v1424_v2, %v1349_v43  ;;  %v739_v43 = vor.u32 1.1754944e-38, %v738_v60 }
 0x26b   :  { %1057 = vpow2.f32 %v633_v51  ;;  %v1056_v55 = vpop.eup %1055  ;;  %v670_v56 = vadd.f32 %v1054_v54, %v1052_v52  ;;  %v798_v7 = vmul.f32 %v1054_v54, %v1374_v10 }
 0x26c   :  { %1059 = vpow2.f32 %v657_v53  ;;  %v756_v61 = vmul.f32 %v1056_v55, %v669_v44  ;;  %vm761_vm2 = vweird.f32 %v1056_v55  ;;  %v735_v12 = vsel %vm1461_vm11, %v1433_v50, %v731_v27 }
 0x26d   :  { %1061 = vrcp.f32 %v670_v56  ;;  %vm1443_vm4 = vmor %vm760_vm3, %vm761_vm2  ;;  %v780_v26 = vand.u32 2147483648, %v670_v56  ;;  %v778_v41 = vand.u32 2147483647, %v670_v56  ;;  %vm774_vm8 = vweird.f32 %v670_v56 }
 0x26e   :  { %v757_v4 = vsub.f32 1.0, %v756_v61  ;;  %v806_v35 = vadd.f32 %v798_v7, %v790_v1  ;;  %v740_v44 = vsel %vm737_vm13, %v739_v43, %v735_v12  ;;  %v803_v47 = vadd.f32 %v795_v9, %v787_v20 }
 0x26f   :  { %v781_v10 = vor.u32 1.1754944e-38, %v780_v26  ;;  %vm779_vm12 = vcmp.eq.f32.partialorder %v778_v41, 8.507059e+37 }
 0x270   :  { %v758_v6 = vmul.f32 %v1056_v55, %v757_v4  ;;  %v811_v52 = vmul.f32 %v803_v47, %v740_v44 }
 0x271   :  { %v1058_v5 = vpop.eup %1057 }
 0x272   :  { %v1060_v36 = vpop.eup %1059  ;;  %v759_v11 = vadd.f32 %v1056_v55, %v758_v6  ;;  %v788_v38 = vmul.f32 %v1058_v5, %v1356_v49 }
 0x273   :  { %v1437_v14 = vadd.f32 %v1060_v36, %v1058_v5  ;;  %v1062_v15 = vpop.eup %1061  ;;  %v796_v42 = vmul.f32 %v1060_v36, %v1381_v16  ;;  %v819_v16 = vmax.f32 %v811_v52, 0.0 }
 0x274   :  { %v770_v18 = vmul.f32 %v1062_v15, %v670_v56  ;;  %v763_v24 = vsel %vm1443_vm4, %v1056_v55, %v759_v11  ;;  %vm775_vm6 = vweird.f32 %v1062_v15 }
 0x275   :  { %1063 = vrcp.f32 %v1437_v14  ;;  %v768_v57 = vsel %vm765_vm5, %v767_v23, %v763_v24  ;;  %vm776_vm10 = vmor %vm774_vm8, %vm775_vm6  ;;  %v752_v37 = vand.u32 2147483648, %v1437_v14  ;;  %v750_v40 = vand.u32 2147483647, %v1437_v14 }
 0x276   :  { %v771_v25 = vsub.f32 1.0, %v770_v18  ;;  %v813_v3 = vmul.f32 %v805_v29, %v768_v57  ;;  %vm746_vm15 = vweird.f32 %v1437_v14  ;;  %v804_v49 = vadd.f32 %v796_v42, %v788_v38 }
 0x277   :  { %v753_v50 = vor.u32 1.1754944e-38, %v752_v37  ;;  %vm751_vm1 = vcmp.eq.f32.partialorder %v750_v40, 8.507059e+37 }
 0x278   :  { %v772_v32 = vmul.f32 %v1062_v15, %v771_v25  ;;  %v821_v45 = vmax.f32 %v813_v3, 0.0 }
 0x27a   :  { %v773_v59 = vadd.f32 %v1062_v15, %v772_v32 }
 0x27b   :  { %v1064_v28 = vpop.eup %1063 }
 0x27c   :  { %v742_v30 = vmul.f32 %v1064_v28, %v1437_v14  ;;  %v777_v0 = vsel %vm776_vm10, %v1062_v15, %v773_v59  ;;  %vm747_vm14 = vweird.f32 %v1064_v28 }
 0x27d   :  { %v782_v34 = vsel %vm779_vm12, %v781_v10, %v777_v0  ;;  %vm748_vm0 = vmor %vm746_vm15, %vm747_vm14 }
 0x27e   :  { %v743_v13 = vsub.f32 1.0, %v742_v30  ;;  %v814_v2 = vmul.f32 %v806_v35, %v782_v34 }
 0x280   :  { %v744_v39 = vmul.f32 %v1064_v28, %v743_v13  ;;  %v822_v46 = vmax.f32 %v814_v2, 0.0 }
 0x282   :  { %v745_v48 = vadd.f32 %v1064_v28, %v744_v39  ;;  %v992_v51 = vpack.c.bf16 %v822_v46, %v821_v45 }
 0x284   :  { %v749_v53 = vsel %vm748_vm0, %v1064_v28, %v745_v48  ;;  %996 = vst [vmem:[#allocation6 + $0x18] sm:$0xff] %v992_v51  }
 0x285   :  { %v754_v54 = vsel %vm751_vm1, %v753_v50, %v749_v53 }
 0x286   :  { %v812_v55 = vmul.f32 %v804_v49, %v754_v54 }
 0x288   :  { %v820_v56 = vmax.f32 %v812_v55, 0.0 }
 0x28a   :  { %v987_v61 = vpack.c.bf16 %v820_v56, %v819_v16 }
 0x28c   :  { %995 = vst [vmem:[#allocation6 + $0x10] sm:$0xff] %v987_v61  }
 0x28d   :  { %851 = dma.vmem_to_hbm [thread:$0]  %s844_s9, 512, %s846_s16, [#allocation7], %s1094_s17, %s1094_s17, %s1095_s18  }
 0x28e   :  { %1089 = dma.done.wait [#allocation7], 512  }
 0x28f   :  { %1090 = vsyncadd [#allocation7], 4294966784 }
 0x290   :  { %856 = vsyncpa [#allocation7], 1 }

</bundles_post_ra>
